<compile_context>
chip_gen: v6e
topology: v6e:2x2x1
jax: 0.10.0
libtpu: 0.0.40
codegen_flags: <defaults>
</compile_context>

<pallas_src>
import functools
import math

import jax
import jax.numpy as jnp
from jax.experimental import pallas as pl
from jax.experimental.pallas import tpu as pltpu


def _round_up(x, m):
    return (x + m - 1) // m * m


# Probe once: does this Pallas build support single-buffered resident blocks?
try:
    pl.BlockSpec((8, 128), lambda i: (0, 0), pipeline_mode=pl.Buffered(1))
    _HAS_BUFFERED1 = True
except Exception:  # pragma: no cover - older Pallas without pipeline_mode
    _HAS_BUFFERED1 = False

_W_BUFS = 1 if _HAS_BUFFERED1 else 2          # buffers per resident weight


def _resident_spec(shape, index_map):
    """Spec for a block whose index never changes across the grid (weights)."""
    if _HAS_BUFFERED1:
        return pl.BlockSpec(shape, index_map, pipeline_mode=pl.Buffered(1))
    return pl.BlockSpec(shape, index_map)


_SQRT_2_OVER_PI = 0.7978845608028654


def _gelu(x):
    # tanh-form GELU (PyTorch approximate='tanh'); ~3e-4 max abs deviation from
    # the exact erf GELU, below the bf16 matmul rounding already accepted.
    return 0.5 * x * (1.0 + jnp.tanh(_SQRT_2_OVER_PI * (x + 0.044715 * x * x * x)))


# ----------------------------------------------------------------------------
# Kernels
# ----------------------------------------------------------------------------
def _ffn_fused_kernel(x_ref, w1_ref, b1_ref, w2_ref, b2_ref, o_ref):
    """out = GELU(x @ W1 + b1) @ W2 + b2, both weights VMEM-resident."""
    x = x_ref[...].astype(jnp.bfloat16)                           # (TM, Dp)
    h = jnp.dot(x, w1_ref[...], preferred_element_type=jnp.float32)
    h = _gelu(h + b1_ref[...])                                    # bias + GELU
    # nn.Dropout(p=0.0) is the identity in the forward pass.
    o = jnp.dot(h.astype(jnp.bfloat16), w2_ref[...],
                preferred_element_type=jnp.float32)
    o_ref[...] = (o + b2_ref[...]).astype(o_ref.dtype)


def _ffn_htiled_kernel(x_ref, w1_ref, b1_ref, w2_ref, b2_ref, o_ref, acc_ref):
    """Hidden-dim-tiled fused FFN; f32 accumulator over H chunks."""
    h_step = pl.program_id(1)

    @pl.when(h_step == 0)
    def _():
        acc_ref[...] = jnp.zeros_like(acc_ref)

    x = x_ref[...].astype(jnp.bfloat16)                           # (TM, Dp)
    h = jnp.dot(x, w1_ref[...], preferred_element_type=jnp.float32)
    h = _gelu(h + b1_ref[...])                                    # exact per-chunk
    acc_ref[...] += jnp.dot(h.astype(jnp.bfloat16), w2_ref[...],
                            preferred_element_type=jnp.float32)

    @pl.when(h_step == pl.num_programs(1) - 1)
    def _():
        o_ref[...] = (acc_ref[...] + b2_ref[...]).astype(o_ref.dtype)


# ----------------------------------------------------------------------------
# VMEM accounting / tile selection
# ----------------------------------------------------------------------------
def _vmem_caps():
    cap = 64 * 1024 * 1024           # conservative default (v7x per-TC VMEM)
    try:
        info = pltpu.get_tpu_info()
        cap = int(getattr(info, "vmem_capacity_bytes", cap))
    except Exception:
        pass
    budget = int(cap * 0.70)         # what our buffers may use
    limit = int(cap * 0.90)          # scoped-VMEM ceiling requested from Mosaic
    return budget, limit


def _fused_vmem_bytes(tm, dp, hp, x_bytes):
    weights = _W_BUFS * (2 * dp * hp * 2 + (hp + dp) * 4)  # bf16 W1+W2, f32 b1+b2
    x_tile = 2 * tm * dp * x_bytes                         # double-buffered input
    out_tile = 2 * tm * dp * 4                             # double-buffered f32 out
    h_interm = tm * hp * 6                                 # f32 h + bf16 copy
    return weights + x_tile + out_tile + h_interm


def _htiled_vmem_bytes(tm, th, dp, x_bytes):
    w_tiles = 2 * (dp * th + th * dp) * 2 + 2 * th * 4 + dp * 4
    x_tile = 2 * tm * dp * x_bytes
    out_tile = 2 * tm * dp * 4
    acc = tm * dp * 4
    h_interm = tm * th * 6
    return w_tiles + x_tile + out_tile + acc + h_interm


_TM_CANDIDATES = (256, 128, 64, 32, 16)   # TM capped at 256: bounds (TM, Hp) h buf
_TH_CANDIDATES = (2048, 1024, 512, 256, 128)


def _pick_tile_m(mp):
    if mp <= 16:
        return mp
    opts = [t for t in _TM_CANDIDATES if mp % t == 0]
    if not opts:
        return mp
    for min_steps in (4, 2, 1):       # prefer >=4 grid steps (>=2 per v7x core)
        for tm in opts:
            if mp // tm >= min_steps:
                return tm
    return opts[-1]


# ----------------------------------------------------------------------------
# Parameter preparation (done once, outside jit): pad to lane-aligned shapes,
# cast weights to bf16.  Weights are given as (in, out), i.e. PyTorch
# Linear.weight transposed.  NOTE: only arrays in the returned dict — Python
# ints here would become tracers under jit (the previous bug).
# ----------------------------------------------------------------------------
def prepare_ffn_params(w1, b1, w2, b2):
    D, H = w1.shape
    assert w2.shape == (H, D) and b1.shape == (H,) and b2.shape == (D,)
    Dp, Hp = _round_up(D, 128), _round_up(H, 128)
    w1f = jnp.pad(jnp.asarray(w1, jnp.float32), ((0, Dp - D), (0, Hp - H)))
    w2f = jnp.pad(jnp.asarray(w2, jnp.float32), ((0, Hp - H), (0, Dp - D)))
    return dict(
        w1=w1f.astype(jnp.bfloat16),
        b1=jnp.pad(jnp.asarray(b1, jnp.float32), (0, Hp - H)).reshape(1, Hp),
        w2=w2f.astype(jnp.bfloat16),
        b2=jnp.pad(jnp.asarray(b2, jnp.float32), (0, Dp - D)).reshape(1, Dp),
    )


# ----------------------------------------------------------------------------
# FeedForward.forward
# ----------------------------------------------------------------------------
def feedforward(x, params, *, force_htiled=False):
    w1, b1, w2, b2 = params["w1"], params["b1"], params["w2"], params["b2"]
    Dp, Hp = w1.shape

    D = x.shape[-1]                      # static under jit
    lead = x.shape[:-1]
    M = math.prod(lead) if lead else 1
    x2 = x.reshape(M, D)
    Mp = _round_up(M, 16)

    aligned = (Mp == M) and (Dp == D)
    if aligned:
        x_in = x2                        # no host pad/cast; cast in-kernel
    else:
        x_in = jnp.pad(x2, ((0, Mp - M), (0, Dp - D))).astype(jnp.bfloat16)
    x_bytes = jnp.dtype(x_in.dtype).itemsize

    budget, vmem_limit = _vmem_caps()
    TM = _pick_tile_m(Mp)

    use_fused = (not force_htiled) and (
        _fused_vmem_bytes(TM, Dp, Hp, x_bytes) <= budget)

    if use_fused:
        out = pl.pallas_call(
            _ffn_fused_kernel,
            out_shape=jax.ShapeDtypeStruct((Mp, Dp), jnp.float32),
            grid_spec=pltpu.PrefetchScalarGridSpec(
                num_scalar_prefetch=0,
                grid=(Mp // TM,),
                in_specs=[
                    pl.BlockSpec((TM, Dp), lambda i: (i, 0)),
                    _resident_spec((Dp, Hp), lambda i: (0, 0)),
                    _resident_spec((1, Hp), lambda i: (0, 0)),
                    _resident_spec((Hp, Dp), lambda i: (0, 0)),
                    _resident_spec((1, Dp), lambda i: (0, 0)),
                ],
                out_specs=pl.BlockSpec((TM, Dp), lambda i: (i, 0)),
            ),
            compiler_params=pltpu.CompilerParams(
                dimension_semantics=("parallel",),
                vmem_limit_bytes=vmem_limit),
        )(x_in, w1, b1, w2, b2)
    else:
        # Hidden-dim-tiled fused kernel (no HBM round trip of the hidden act).
        tm_opts = [t for t in _TM_CANDIDATES if Mp % t == 0] or [Mp]
        th_opts = [t for t in _TH_CANDIDATES if Hp % t == 0] or [Hp]
        if force_htiled:                 # test hook: prefer multi-step grids
            tm_opts = [t for t in tm_opts if Mp // t >= 2] or tm_opts
            th_opts = [t for t in th_opts if Hp // t >= 2] or th_opts
        TM, TH = tm_opts[-1], th_opts[-1]
        for tm in tm_opts:               # largest TM, then largest TH that fits
            fitting = [th for th in th_opts
                       if _htiled_vmem_bytes(tm, th, Dp, x_bytes) <= budget]
            if fitting:
                TM, TH = tm, fitting[0]
                break

        out = pl.pallas_call(
            _ffn_htiled_kernel,
            out_shape=jax.ShapeDtypeStruct((Mp, Dp), jnp.float32),
            grid_spec=pltpu.PrefetchScalarGridSpec(
                num_scalar_prefetch=0,
                grid=(Mp // TM, Hp // TH),
                in_specs=[
                    pl.BlockSpec((TM, Dp), lambda i, h: (i, 0)),
                    pl.BlockSpec((Dp, TH), lambda i, h: (0, h)),
                    pl.BlockSpec((1, TH), lambda i, h: (0, h)),
                    pl.BlockSpec((TH, Dp), lambda i, h: (h, 0)),
                    pl.BlockSpec((1, Dp), lambda i, h: (0, 0)),
                ],
                out_specs=pl.BlockSpec((TM, Dp), lambda i, h: (i, 0)),
                scratch_shapes=[pltpu.VMEM((TM, Dp), jnp.float32)],
            ),
            compiler_params=pltpu.CompilerParams(
                dimension_semantics=("parallel", "arbitrary"),
                vmem_limit_bytes=vmem_limit),
        )(x_in, w1, b1, w2, b2)

    if aligned:
        return out.reshape(*lead, D)
    return out[:M, :D].reshape(*lead, D)


if __name__ == "__main__":
    key = jax.random.PRNGKey(0)
    k1, k2, k3, k4, kx = jax.random.split(key, 5)

    B, N, DIM, HIDDEN = 2, 16, 256, 512
    w1 = 0.02 * jax.random.normal(k1, (DIM, HIDDEN), jnp.float32)
    b1 = 0.01 * jax.random.normal(k2, (HIDDEN,), jnp.float32)
    w2 = 0.02 * jax.random.normal(k3, (HIDDEN, DIM), jnp.float32)
    b2 = 0.01 * jax.random.normal(k4, (DIM,), jnp.float32)
    x = jax.random.normal(kx, (B, N, DIM), jnp.float32)

    params = prepare_ffn_params(w1, b1, w2, b2)   # pre-pad / pre-cast, outside jit

    # Plain-JAX reference (exact erf GELU, f32).
    ref = jnp.dot(jax.nn.gelu(jnp.dot(x, w1) + b1, approximate=False), w2) + b2

    # Fused resident-weight path.
    fwd = jax.jit(feedforward)
    out = fwd(x, params)
    jax.block_until_ready(out)
    assert out.shape == (B, N, DIM), out.shape
    err = float(jnp.max(jnp.abs(out - ref)))
    assert err < 2e-2, err

    # Also exercise the hidden-dim-tiled (large-shape) path at small shapes.
    fwd_ht = jax.jit(functools.partial(feedforward, force_htiled=True))
    out_ht = fwd_ht(x, params)
    jax.block_until_ready(out_ht)
    err_ht = float(jnp.max(jnp.abs(out_ht - ref)))
    assert err_ht < 2e-2, err_ht

    print("KERNEL_OK")
</pallas_src>

<mosaic_0001>
module attributes {stable_mosaic.version = 11 : i64} {
  func.func @_ffn_fused_kernel(%arg0: i32, %arg1: memref<16x256xf32, #tpu.memory_space<vmem>>, %arg2: memref<256x512xbf16, #tpu.memory_space<vmem>>, %arg3: memref<1x512xf32, #tpu.memory_space<vmem>>, %arg4: memref<512x256xbf16, #tpu.memory_space<vmem>>, %arg5: memref<1x256xf32, #tpu.memory_space<vmem>>, %arg6: memref<16x256xf32, #tpu.memory_space<vmem>>) attributes {dimension_semantics = [#tpu.dimension_semantics<parallel>], iteration_bounds = array<i64: 2>, scalar_prefetch = 0 : i64, scratch_operands = 0 : i64, tpu.core_type = #tpu.core_type<tc>, window_params = [{transform_indices = @transform_0, window_bounds = array<i64: 16, 256>}, {pipeline_mode = #tpu.pipeline_mode<synchronous>, transform_indices = @transform_1, window_bounds = array<i64: 256, 512>}, {pipeline_mode = #tpu.pipeline_mode<synchronous>, transform_indices = @transform_2, window_bounds = array<i64: 1, 512>}, {pipeline_mode = #tpu.pipeline_mode<synchronous>, transform_indices = @transform_3, window_bounds = array<i64: 512, 256>}, {pipeline_mode = #tpu.pipeline_mode<synchronous>, transform_indices = @transform_4, window_bounds = array<i64: 1, 256>}, {transform_indices = @transform_5, window_bounds = array<i64: 16, 256>}]} {
    %c0 = arith.constant 0 : index
    %c0_0 = arith.constant 0 : index
    %0 = vector.load %arg1[%c0, %c0_0] : memref<16x256xf32, #tpu.memory_space<vmem>>, vector<16x256xf32>
    %1 = arith.truncf %0 : vector<16x256xf32> to vector<16x256xbf16>
    %c0_1 = arith.constant 0 : index
    %c0_2 = arith.constant 0 : index
    %2 = vector.load %arg2[%c0_1, %c0_2] : memref<256x512xbf16, #tpu.memory_space<vmem>>, vector<256x512xbf16>
    %cst = arith.constant dense<0.000000e+00> : vector<16x512xf32>
    %3 = tpu.matmul %1, %2, %cst {dimension_numbers = #tpu.dot_dimension_numbers<[1], [0], [0], [1], [0, 0, 1, 1], [], []>} : vector<16x256xbf16>, vector<256x512xbf16>, vector<16x512xf32> -> vector<16x512xf32>
    %c0_3 = arith.constant 0 : index
    %c0_4 = arith.constant 0 : index
    %4 = vector.load %arg3[%c0_3, %c0_4] : memref<1x512xf32, #tpu.memory_space<vmem>>, vector<1x512xf32>
    %5 = vector.broadcast %4 : vector<1x512xf32> to vector<16x512xf32>
    %6 = arith.addf %3, %5 : vector<16x512xf32>
    %cst_5 = arith.constant 5.000000e-01 : f32
    %7 = vector.broadcast %cst_5 : f32 to vector<16x512xf32>
    %8 = arith.mulf %7, %6 : vector<16x512xf32>
    %cst_6 = arith.constant 4.471500e-02 : f32
    %9 = vector.broadcast %cst_6 : f32 to vector<16x512xf32>
    %10 = arith.mulf %9, %6 : vector<16x512xf32>
    %11 = arith.mulf %10, %6 : vector<16x512xf32>
    %12 = arith.mulf %11, %6 : vector<16x512xf32>
    %13 = arith.addf %6, %12 : vector<16x512xf32>
    %cst_7 = arith.constant 0.797884583 : f32
    %14 = vector.broadcast %cst_7 : f32 to vector<16x512xf32>
    %15 = arith.mulf %14, %13 : vector<16x512xf32>
    %16 = math.tanh %15 : vector<16x512xf32>
    %cst_8 = arith.constant 1.000000e+00 : f32
    %17 = vector.broadcast %cst_8 : f32 to vector<16x512xf32>
    %18 = arith.addf %17, %16 : vector<16x512xf32>
    %19 = arith.mulf %8, %18 : vector<16x512xf32>
    %20 = arith.truncf %19 : vector<16x512xf32> to vector<16x512xbf16>
    %c0_9 = arith.constant 0 : index
    %c0_10 = arith.constant 0 : index
    %21 = vector.load %arg4[%c0_9, %c0_10] : memref<512x256xbf16, #tpu.memory_space<vmem>>, vector<512x256xbf16>
    %cst_11 = arith.constant dense<0.000000e+00> : vector<16x256xf32>
    %22 = tpu.matmul %20, %21, %cst_11 {dimension_numbers = #tpu.dot_dimension_numbers<[1], [0], [0], [1], [0, 0, 1, 1], [], []>} : vector<16x512xbf16>, vector<512x256xbf16>, vector<16x256xf32> -> vector<16x256xf32>
    %c0_12 = arith.constant 0 : index
    %c0_13 = arith.constant 0 : index
    %23 = vector.load %arg5[%c0_12, %c0_13] : memref<1x256xf32, #tpu.memory_space<vmem>>, vector<1x256xf32>
    %24 = vector.broadcast %23 : vector<1x256xf32> to vector<16x256xf32>
    %25 = arith.addf %22, %24 : vector<16x256xf32>
    %c0_14 = arith.constant 0 : index
    %c0_15 = arith.constant 0 : index
    %26 = vector.load %arg6[%c0_14, %c0_15] : memref<16x256xf32, #tpu.memory_space<vmem>>, vector<16x256xf32>
    tpu.vector_store %arg6[%c0_14, %c0_15], %25 {strides = array<i32>} : memref<16x256xf32, #tpu.memory_space<vmem>>, vector<16x256xf32>,
    return
  }
  func.func @transform_0(%arg0: i32) -> (i32, i32) {
    %c0_i32 = arith.constant 0 : i32
    %c0_i32_0 = arith.constant 0 : i32
    return %arg0, %c0_i32 : i32, i32
  }
  func.func @transform_1(%arg0: i32) -> (i32, i32) {
    %c0_i32 = arith.constant 0 : i32
    %c0_i32_0 = arith.constant 0 : i32
    %c0_i32_1 = arith.constant 0 : i32
    return %c0_i32, %c0_i32_0 : i32, i32
  }
  func.func @transform_2(%arg0: i32) -> (i32, i32) {
    %c0_i32 = arith.constant 0 : i32
    %c0_i32_0 = arith.constant 0 : i32
    %c0_i32_1 = arith.constant 0 : i32
    return %c0_i32, %c0_i32_0 : i32, i32
  }
  func.func @transform_3(%arg0: i32) -> (i32, i32) {
    %c0_i32 = arith.constant 0 : i32
    %c0_i32_0 = arith.constant 0 : i32
    %c0_i32_1 = arith.constant 0 : i32
    return %c0_i32, %c0_i32_0 : i32, i32
  }
  func.func @transform_4(%arg0: i32) -> (i32, i32) {
    %c0_i32 = arith.constant 0 : i32
    %c0_i32_0 = arith.constant 0 : i32
    %c0_i32_1 = arith.constant 0 : i32
    return %c0_i32, %c0_i32_0 : i32, i32
  }
  func.func @transform_5(%arg0: i32) -> (i32, i32) {
    %c0_i32 = arith.constant 0 : i32
    %c0_i32_0 = arith.constant 0 : i32
    return %arg0, %c0_i32 : i32, i32
  }
}

</mosaic_0001>

<bundles_post_ra>
// kernel: feedforward.1
= control target key start
LH: loop header
LB: loop body
LE: loop exit
PB: predicated region body
PF: predicated region fallthrough
CT: control target
= control target key end

     0   :  { %10 = vsyncpa [#allocation3], 0  ;;  %s2392_s0 = inlined_call_operand.hbm [shape: f32[32,256], index: 0, kind: input, shape index: {}]   ;;  %s2393_s1 = inlined_call_operand.hbm [shape: bf16[256,512], index: 1, kind: input, shape index: {}]   ;;  %s2394_s2 = inlined_call_operand.hbm [shape: f32[1,512], index: 2, kind: input, shape index: {}]   ;;  %s2395_s3 = inlined_call_operand.hbm [shape: bf16[512,256], index: 3, kind: input, shape index: {}]   ;;  %s2396_s4 = inlined_call_operand.vmem [shape: f32[1,256], index: 4, kind: input, shape index: {}]   ;;  %s2397_s5 = inlined_call_operand.hbm [shape: f32[32,256], index: 5, kind: output, shape index: {}]  }
   0x1   :  { %12 = vsyncpa [#allocation3 + $0x1], 0 }
   0x2   :  { %13 = vsyncpa [#allocation6], 0 }
   0x3   :  { %14 = vsyncpa [#allocation9], 0 }
   0x4   :  { %15 = vsyncpa [#allocation4], 0 }
   0x5   :  { %17 = vsyncpa [#allocation4 + $0x1], 0  ;;  %s2131_s18 = smov 0   ;;  %s2133_s19 = smov 0  }
   0x6   :  { %s2135_s20 = smov 0   ;;  %s2137_s21 = smov 0  }
   0x7 LB: > { %s2152_s22 = sadd.s32 4294967295, %s2088_s21   ;;  %s1465_s23 = sadd.s32 4294967294, %s2088_s21   ;;  %s2088_s21 = sphi %s2137_s21, %s2423_s21   ;;  %s2084_s20 = sphi %s2135_s20, %s2422_s20   ;;  %s2080_s19 = sphi %s2133_s19, %s2421_s19   ;;  %s2076_s18 = sphi %s2131_s18, %s2420_s18  }
   0x8   : > { %p43_p0 = scmp.ne.s32.totalorder %s2080_s19, %s2076_s18  ;;  %p2398_p1 = scmp.eq.s32.totalorder %s2152_s22, 0 }
   0x9   : > { %p157_p3 = scmp.eq.s32.totalorder %s1465_s23, 1  ;;  %p1466_p5 = scmp.ge.s32.totalorder %s2088_s21, 1 }
   0xa   : > { %p2161_p4 = por %p2398_p1, %p43_p0  ;;  %p164_p7 = scmp.lt.s32.totalorder %s2088_s21, 3 }
   0xb   : > { %p2166_p6 = por %p157_p3, %p43_p0  ;;  %s2090_s27 = smov [#allocation5]  }
   0xc   : > { %s2403_s24 = scalar_select %p2161_p4, 1, 0 }
   0xd   : > { %s2404_s25 = scalar_select %p2166_p6, 1, 0 }
   0xe   : > { %p2171_p8 = pnand %p1466_p5, %p164_p7  ;;  %s176_s28 = sshll.u32 %s2090_s27, 4  ;;  %s177_s28 = int_to_ptr.vmem [resolvable:$true] %s176_s28 }
   0xf   : > { %s2091_s30 = smov [#allocation7]   ;;  %s2092_s7 = smov [#allocation8]  }
  0x10   : > { %s2405_s26 = scalar_select %p2171_p8, 1, 0 }
  0x11   : > { %p1635_p9 = pneg %p2171_p8  ;;  %s190_s6 = sshll.u32 %s2091_s30, 4  ;;  %s191_s6 = int_to_ptr.vmem [resolvable:$true] %s190_s6 }
  0x12   : > { %s200_s8 = sshll.u32 %s2092_s7, 4  ;;  %s1921_s9 = scalar_lea.vmem %s177_s28, 8192  ;;  %s201_s8 = int_to_ptr.vmem [resolvable:$true] %s200_s8 }
  0x13   : > { %p2180_p11 = pnand %p1635_p9, %p2398_p1  ;;  %p1922_p13 = scmp.ne.s32.totalorder %s177_s28, %s1921_s9 }
  0x14   : > { %p1929_p5 = scmp.lt.s32.totalorder %s177_s28, %s177_s28  ;;  %p1930_p7 = scmp.lt.s32.totalorder %s1921_s9, %s1921_s9 }
  0x15   : > { %p1912_p12 = pneg %p2180_p11 }
  0x16   : > { %p1931_p9 = por %p1930_p7, %p1929_p5 }
  0x17   : > { %p1924_p0 = pnand %p1922_p13, %p1912_p12 }
  0x19   : > { %p1925_p3 = pneg %p1924_p0 }
  0x1b   : > { %p1932_p10 = pnand %p1931_p9, %p1925_p3 }
  0x1d   : > { %1935 = shalt.err (!%p1932_p10)
}
  0x1e   : > { %s2400_s10 = smov 256   ;;  %s2094_s11 = smov 16  }
  0x1f   : > { %1638 = dma.hbm_to_vmem [thread:$0]  (!%p2180_p11), %s2393_s1, 8192, %s177_s28, [#allocation6], %s2400_s10, %s2400_s10, %s2094_s11  }
  0x20   : > { %s1947_s14 = scalar_lea.vmem %s191_s6, 64  ;;  %p1955_p3 = scmp.lt.s32.totalorder %s191_s6, %s191_s6 }
  0x21   : > { %p1948_p13 = scmp.ne.s32.totalorder %s191_s6, %s1947_s14  ;;  %p1956_p10 = scmp.lt.s32.totalorder %s1947_s14, %s1947_s14 }
  0x23   : > { %p1950_p0 = pnand %p1948_p13, %p1912_p12  ;;  %p1957_p7 = por %p1956_p10, %p1955_p3 }
  0x25   : > { %p1951_p5 = pneg %p1950_p0 }
  0x27   : > { %p1958_p9 = pnand %p1957_p7, %p1951_p5 }
  0x29   : > { %1961 = shalt.err (!%p1958_p9)
}
  0x2a   : > { %1641 = dma.hbm_to_vmem [thread:$0]  (!%p2180_p11), %s2394_s2, 64, %s191_s6, [#allocation6]  }
  0x2b   : > { %s1973_s17 = scalar_lea.vmem %s201_s8, 8192  ;;  %p1981_p0 = scmp.lt.s32.totalorder %s201_s8, %s201_s8 }
  0x2c   : > { %p1974_p1 = scmp.ne.s32.totalorder %s201_s8, %s1973_s17  ;;  %p1982_p6 = scmp.lt.s32.totalorder %s1973_s17, %s1973_s17 }
  0x2e   : > { %p1976_p2 = pnand %p1974_p1, %p1912_p12  ;;  %p1983_p4 = por %p1982_p6, %p1981_p0 }
  0x30   : > { %p1977_p13 = pneg %p1976_p2 }
  0x32   : > { %p1984_p3 = pnand %p1983_p4, %p1977_p13 }
  0x34   : > { %1987 = shalt.err (!%p1984_p3)
}
  0x35   : > { %s2095_s23 = smov 128   ;;  %s2096_s27 = smov 8  }
  0x36   : > { %1644 = dma.hbm_to_vmem [thread:$0]  (!%p2180_p11), %s2395_s3, 8192, %s201_s8, [#allocation9], %s2095_s23, %s2095_s23, %s2096_s27  }
  0x37   : > { %s2214_s6 = sadd.s32 1, %s2088_s21   ;;  %s30_s9 = sadd.s32 1, %s2084_s20 }
  0x38   : > { %s27_s7 = ssub.s32 %s2088_s21, %s2214_s6  ;;  %p37_p2 = scmp.ne.s32.totalorder %s2084_s20, %s2080_s19 }
  0x39   : > { %p28_p1 = scmp.eq.s32.totalorder %s27_s7, 0  ;;  %p38_p4 = scmp.eq.s32.totalorder %s2088_s21, 0 }
  0x3a   : > { %p1656_p6 = scmp.lt.s32.totalorder %s2088_s21, 2  ;;  %p2407_p5 = scmp.eq.s32.totalorder %s2152_s22, 1 }
  0x3b   : > { %s2224_s12 = scalar_select %p28_p1, %s2084_s20, %s30_s9  }
  0x3c   : > { %p39_p12 = por %p38_p4, %p37_p2  ;;  %p2228_p10 = por %p2407_p5, %p37_p2 }
  0x3d   : > { %s217_s29 = sand.u32 1, %s2084_s20   ;;  %s1616_s14 = sshll.u32 %s2088_s21, 9 }
  0x3e   : > { %s2408_s13 = scalar_select %p2228_p10, 1, 0 }
  0x3f   : > { %s1471_s8 = sshll.u32 %s217_s29, 5  ;;  %s2237_s17 = scalar_lea.hbm %s2392_s0, %s1616_s14 }
  0x40   : > { %s221_s23 = scalar_lea.vmem [#allocation2], %s1471_s8  ;;  %p2239_p11 = pnand %p1656_p6, %p39_p12 }
  0x41   : > { %s229_s27 = sshll.u32 %s221_s23, 4  ;;  %s2245_s30 = scalar_lea.sflag [#allocation3], %s217_s29  ;;  %s2243_s27 = int_to_ptr.vmem [resolvable:$true] %s229_s27 }
  0x42   : > { %s1988_s7 = scalar_lea.hbm %s2237_s17, 512  ;;  %p1990_p9 = pneg %p2239_p11 }
  0x43   : > { %p1989_p7 = scmp.ne.s32.totalorder %s2237_s17, %s1988_s7  ;;  %s1993_s8 = scalar_lea.hbm %s2392_s0, 1024 }
  0x44   : > { %p1994_p3 = scmp.lt.s32.totalorder %s2237_s17, %s2392_s0  ;;  %p1995_p1 = scmp.lt.s32.totalorder %s1993_s8, %s1988_s7 }
  0x45   : > { %p1991_p13 = pnand %p1990_p9, %p1989_p7 }
  0x46   : > { %p1996_p2 = por %p1995_p1, %p1994_p3 }
  0x47   : > { %p1992_p0 = pneg %p1991_p13 }
  0x49   : > { %p1997_p4 = pnand %p1996_p2, %p1992_p0 }
  0x4b   : > { %2000 = shalt.err (!%p1997_p4)
}
  0x4c   : > { %s2001_s29 = scalar_lea.vmem %s2243_s27, 512  ;;  %s2097_s23 = smov [#allocation2]  }
  0x4d   : > { %p2002_p6 = scmp.ne.s32.totalorder %s2243_s27, %s2001_s29  ;;  %s2006_s10 = sshll.u32 %s2097_s23, 4  ;;  %s2007_s10 = int_to_ptr.vmem [resolvable:$false] %s2006_s10 }
  0x4e   : > { %s2008_s9 = scalar_lea.vmem %s2007_s10, 1024  ;;  %p2009_p7 = scmp.lt.s32.totalorder %s2243_s27, %s2007_s10 }
  0x4f   : > { %p2004_p12 = pnand %p2002_p6, %p1990_p9  ;;  %p2010_p13 = scmp.lt.s32.totalorder %s2008_s9, %s2001_s29 }
  0x51   : > { %p2005_p5 = pneg %p2004_p12  ;;  %p2011_p10 = por %p2010_p13, %p2009_p7 }
  0x53   : > { %p2012_p8 = pnand %p2011_p10, %p2005_p5 }
  0x55   : > { %2015 = shalt.err (!%p2012_p8)
}
  0x56   : > { %s2410_s7 = smov 256   ;;  %p2411_p9 = scmp.ne.s32.totalorder %s2405_s26, 0 }
  0x57   : > { %1648 = dma.hbm_to_vmem [thread:$0]  (!%p2239_p11), %s2237_s17, 512, %s2243_s27, %s2245_s30, %s2410_s7, %s2410_s7, %s2094_s11  }
  0x58   : > { %241 = sbr.rel (%p2411_p9) target bundleno = 615 (0x267), region = 40  ;;  %s2272_s14 = sand.u32 (!%p2411_p9), 1, %s2080_s19  }
  0x59   : > { %s1476_s10 = sshll.u32 (!%p2411_p9), %s2272_s14, 5  ;;  %s244_s8 = scalar_lea.sflag (!%p2411_p9), [#allocation3], %s2272_s14 }
  0x5a   : > { %s2278_s28 = scalar_lea.vmem (!%p2411_p9), [#allocation2], %s1476_s10  ;;  %p2412_p8 = scmp.ne.s32.totalorder (!%p2411_p9), %s2403_s24, 0 }
  0x5d   : > { %2059 = dma.done.wait (%p2412_p8), %s244_s8, 512  }
  0x5e   : > { %2061 = vsyncadd (%p2412_p8), %s244_s8, 4294966784  ;;  %p2413_p10 = scmp.eq.s32.totalorder %s2152_s22, 0 }
  0x60   : > { %2063 = dma.done.wait (%p2413_p10), [#allocation6], 8256   ;;  %p2414_p11 = pmov %p2413_p10 }
  0x61   : > { %p2415_p0 = pmov %p2413_p10 }
  0x62   : > { %2065 = vsyncadd (%p2414_p11), [#allocation6], 4294959040 }
  0x63   : > { %2067 = dma.done.wait (%p2415_p0), [#allocation9], 8192   ;;  %p2416_p3 = pmov %p2415_p0 }
  0x64   : > { %v1702_v0 = vld [vmem:[#allocation5 + $0xe4] ss:$16 sps:$4 sm:$0xff]   ;;  %v1704_v1 = vld [vmem:[#allocation5 + $0xec] ss:$16 sps:$4 sm:$0xff]   ;;  %v1706_v2 = vld [vmem:[#allocation5 + $0xe0] ss:$16 sps:$4 sm:$0xff]  }
  0x65   : > { %2069 = vsyncadd (%p2416_p3), [#allocation9], 4294959104  ;;  %700 = vmatprep.subr.bf16.mxu0 %v1702_v0  ;;  %v1707_v3 = vld [vmem:[#allocation5 + $0xe8] ss:$16 sps:$4 sm:$0xff]   ;;  %743 = vmatprep.subr.bf16.mxu1 %v1704_v1  ;;  %v1708_v4 = vld [vmem:[#allocation5 + $0xc4] ss:$16 sps:$4 sm:$0xff]  }
  0x66   : > { %701 = vmatpush1.bf16.msra.mxu0 %v1706_v2  ;;  %744 = vmatpush1.bf16.msra.mxu1 %v1707_v3  ;;  %v1710_v5 = vld [vmem:[#allocation5 + $0xcc] ss:$16 sps:$4 sm:$0xff]   ;;  %v1712_v6 = vld [vmem:[#allocation5 + $0xc0] ss:$16 sps:$4 sm:$0xff]   ;;  %v1713_v7 = vld [vmem:[#allocation5 + $0xc8] ss:$16 sps:$4 sm:$0xff]  }
  0x67   : > { %702 = vmatprep.subr.bf16.mxu0 %v1708_v4  ;;  %745 = vmatprep.subr.bf16.mxu1 %v1710_v5  ;;  %v1714_v8 = vld [vmem:[#allocation5 + $0xa4] ss:$16 sps:$4 sm:$0xff]   ;;  %v1716_v9 = vld [vmem:[#allocation5 + $0xac] ss:$16 sps:$4 sm:$0xff]   ;;  %v1718_v10 = vld [vmem:[#allocation5 + $0xa0] ss:$16 sps:$4 sm:$0xff]  }
  0x68   : > { %v1719_v11 = vld [vmem:[#allocation5 + $0xa8] ss:$16 sps:$4 sm:$0xff]   ;;  %v1720_v12 = vld [vmem:[#allocation5 + $0x84] ss:$16 sps:$4 sm:$0xff]   ;;  %v1722_v13 = vld [vmem:[#allocation5 + $0x8c] ss:$16 sps:$4 sm:$0xff]  }
  0x69   : > { %v1724_v14 = vld [vmem:[#allocation5 + $0x80] ss:$16 sps:$4 sm:$0xff]   ;;  %v1725_v15 = vld [vmem:[#allocation5 + $0x88] ss:$16 sps:$4 sm:$0xff]   ;;  %v1726_v16 = vld [vmem:[#allocation5 + $0x64] ss:$16 sps:$4 sm:$0xff]  }
  0x6a   : > { %703 = vmatpush1.bf16.msra.mxu0 %v1712_v6  ;;  %746 = vmatpush1.bf16.msra.mxu1 %v1713_v7  ;;  %v1728_v17 = vld [vmem:[#allocation5 + $0x6c] ss:$16 sps:$4 sm:$0xff]   ;;  %v1730_v18 = vld [vmem:[#allocation5 + $0x60] ss:$16 sps:$4 sm:$0xff]   ;;  %v1731_v19 = vld [vmem:[#allocation5 + $0x68] ss:$16 sps:$4 sm:$0xff]  }
  0x6b   : > { %704 = vmatprep.subr.bf16.mxu0 %v1714_v8  ;;  %747 = vmatprep.subr.bf16.mxu1 %v1716_v9  ;;  %v1732_v20 = vld [vmem:[#allocation5 + $0x44] ss:$16 sps:$4 sm:$0xff]   ;;  %v1734_v21 = vld [vmem:[#allocation5 + $0x4c] ss:$16 sps:$4 sm:$0xff]   ;;  %v1736_v22 = vld [vmem:[#allocation5 + $0x40] ss:$16 sps:$4 sm:$0xff]  }
  0x6c   : > { %v1737_v23 = vld [vmem:[#allocation5 + $0x48] ss:$16 sps:$4 sm:$0xff]   ;;  %v1738_v24 = vld [vmem:[#allocation5 + $0x24] ss:$16 sps:$4 sm:$0xff]   ;;  %v1740_v25 = vld [vmem:[#allocation5 + $0x2c] ss:$16 sps:$4 sm:$0xff]  }
  0x6d   : > { %v1742_v26 = vld [vmem:[#allocation5 + $0x20] ss:$16 sps:$4 sm:$0xff]   ;;  %v1743_v27 = vld [vmem:[#allocation5 + $0x28] ss:$16 sps:$4 sm:$0xff]   ;;  %v1744_v28 = vld [vmem:[#allocation5 + $0x4] ss:$16 sps:$4 sm:$0xff]  }
  0x6e   : > { %705 = vmatpush1.bf16.msra.mxu0 %v1718_v10  ;;  %748 = vmatpush1.bf16.msra.mxu1 %v1719_v11  ;;  %v1746_v29 = vld [vmem:[#allocation5 + $0xc] ss:$16 sps:$4 sm:$0xff]   ;;  %v1748_v30 = vld [vmem:[#allocation5] ss:$16 sps:$4 sm:$0xff]   ;;  %v1749_v31 = vld [vmem:[#allocation5 + $0x8] ss:$16 sps:$4 sm:$0xff]  }
  0x6f   : > { %706 = vmatprep.subr.bf16.mxu0 %v1720_v12  ;;  %749 = vmatprep.subr.bf16.mxu1 %v1722_v13  ;;  %v1750_v32 = vld [vmem:[#allocation5 + $0x1e4] ss:$16 sps:$4 sm:$0xff]   ;;  %v1752_v33 = vld [vmem:[#allocation5 + $0x1ec] ss:$16 sps:$4 sm:$0xff]   ;;  %v1754_v34 = vld [vmem:[#allocation5 + $0x1e0] ss:$16 sps:$4 sm:$0xff]  }
  0x70   : > { %v1755_v35 = vld [vmem:[#allocation5 + $0x1e8] ss:$16 sps:$4 sm:$0xff]   ;;  %v1756_v36 = vld [vmem:[#allocation5 + $0x1c4] ss:$16 sps:$4 sm:$0xff]   ;;  %v1758_v37 = vld [vmem:[#allocation5 + $0x1cc] ss:$16 sps:$4 sm:$0xff]  }
  0x71   : > { %v1760_v38 = vld [vmem:[#allocation5 + $0x1c0] ss:$16 sps:$4 sm:$0xff]   ;;  %v1761_v39 = vld [vmem:[#allocation5 + $0x1c8] ss:$16 sps:$4 sm:$0xff]   ;;  %v1762_v40 = vld [vmem:[#allocation5 + $0x1a4] ss:$16 sps:$4 sm:$0xff]  }
  0x72   : > { %707 = vmatpush1.bf16.msra.mxu0 %v1724_v14  ;;  %750 = vmatpush1.bf16.msra.mxu1 %v1725_v15  ;;  %v1764_v41 = vld [vmem:[#allocation5 + $0x1ac] ss:$16 sps:$4 sm:$0xff]   ;;  %v1766_v42 = vld [vmem:[#allocation5 + $0x1a0] ss:$16 sps:$4 sm:$0xff]   ;;  %v1767_v43 = vld [vmem:[#allocation5 + $0x1a8] ss:$16 sps:$4 sm:$0xff]  }
  0x73   : > { %708 = vmatprep.subr.bf16.mxu0 %v1726_v16  ;;  %751 = vmatprep.subr.bf16.mxu1 %v1728_v17  ;;  %v1768_v44 = vld [vmem:[#allocation5 + $0x184] ss:$16 sps:$4 sm:$0xff]   ;;  %v1770_v45 = vld [vmem:[#allocation5 + $0x18c] ss:$16 sps:$4 sm:$0xff]   ;;  %v1772_v47 = vld [vmem:[#allocation5 + $0x180] ss:$16 sps:$4 sm:$0xff]  }
  0x74   : > { %v289_v46 = vld [vmem:[%s2278_s28 + $0x8] sm:$0xff]  ;;  %v291_v49 = vld [vmem:[%s2278_s28 + $0x18] sm:$0xff]  ;;  %v1774_v50 = vld [vmem:[#allocation5 + $0x164] ss:$16 sps:$4 sm:$0xff]   ;;  %s285_s11 = scalar_lea.vmem [#allocation10], %s1476_s10  ;;  %s1618_s27 = sshll.u32 %s2152_s22, 9 }
  0x75   : > { %v1773_v48 = vld [vmem:[#allocation5 + $0x188] ss:$16 sps:$4 sm:$0xff]   ;;  %v293_v51 = vpack.c.bf16 %v291_v49, %v289_v46  ;;  %v1776_v52 = vld [vmem:[#allocation5 + $0x16c] ss:$16 sps:$4 sm:$0xff]   ;;  %v1778_v53 = vld [vmem:[#allocation5 + $0x160] ss:$16 sps:$4 sm:$0xff]   ;;  %s2349_s16 = scalar_lea.hbm %s2397_s5, %s1618_s27 }
  0x76   : > { %709 = vmatpush1.bf16.msra.mxu0 %v1730_v18  ;;  %752 = vmatpush1.bf16.msra.mxu1 %v1731_v19  ;;  %v1779_v54 = vld [vmem:[#allocation5 + $0x168] ss:$16 sps:$4 sm:$0xff]   ;;  %v1780_v55 = vld [vmem:[#allocation5 + $0x144] ss:$16 sps:$4 sm:$0xff]   ;;  %v1782_v56 = vld [vmem:[#allocation5 + $0x14c] ss:$16 sps:$4 sm:$0xff]  }
  0x77   : > { %710 = vmatprep.subr.bf16.mxu0 %v1732_v20  ;;  %753 = vmatprep.subr.bf16.mxu1 %v1734_v21  ;;  %v1784_v57 = vld [vmem:[#allocation5 + $0x140] ss:$16 sps:$4 sm:$0xff]   ;;  %v1785_v58 = vld [vmem:[#allocation5 + $0x148] ss:$16 sps:$4 sm:$0xff]   ;;  %v1786_v59 = vld [vmem:[#allocation5 + $0x124] ss:$16 sps:$4 sm:$0xff]  }
  0x78   : > { %732 = vmatprep.mubr.bf16.mxu0 %v293_v51  ;;  %775 = vmatprep.mubr.bf16.mxu1 %v293_v51  ;;  %v1788_v60 = vld [vmem:[#allocation5 + $0x12c] ss:$16 sps:$4 sm:$0xff]   ;;  %v1790_v61 = vld [vmem:[#allocation5 + $0x120] ss:$16 sps:$4 sm:$0xff]   ;;  %v1791_v62 = vld [vmem:[#allocation5 + $0x128] ss:$16 sps:$4 sm:$0xff]  }
  0x79   : > { %v1792_v63 = vld [vmem:[#allocation5 + $0x104] ss:$16 sps:$4 sm:$0xff]   ;;  %v1794_v0 = vld [vmem:[#allocation5 + $0x10c] ss:$16 sps:$4 sm:$0xff]   ;;  %v1796_v1 = vld [vmem:[#allocation5 + $0x100] ss:$16 sps:$4 sm:$0xff]  }
  0x7a   : > { %711 = vmatpush1.bf16.msra.mxu0 %v1736_v22  ;;  %754 = vmatpush1.bf16.msra.mxu1 %v1737_v23  ;;  %v1797_v2 = vld [vmem:[#allocation5 + $0x108] ss:$16 sps:$4 sm:$0xff]   ;;  %v288_v3 = vld [vmem:[%s2278_s28] sm:$0xff]  ;;  %v290_v4 = vld [vmem:[%s2278_s28 + $0x10] sm:$0xff]  ;;  %s1363_s17 = sshll.u32 %s285_s11, 4  ;;  %s1349_s29 = scalar_lea.sflag [#allocation4], %s2272_s14  ;;  %s2344_s17 = int_to_ptr.vmem [resolvable:$true] %s1363_s17 }
  0x7b   : > { %712 = vmatprep.subr.bf16.mxu0 %v1738_v24  ;;  %755 = vmatprep.subr.bf16.mxu1 %v1740_v25  ;;  %v1800_v5 = vld [vmem:[#allocation8 + $0x74] ss:$8 sps:$4 sm:$0xff]   ;;  %v1798_v7 = vld [vmem:[#allocation8 + $0x70] ss:$8 sps:$4 sm:$0xff]   ;;  %v292_v9 = vpack.c.bf16 %v290_v4, %v288_v3  ;;  %v1806_v10 = vld [vmem:[#allocation8 + $0x64] ss:$8 sps:$4 sm:$0xff]  }
  0x7c   : > { %v1803_v6 = vld [vmem:[#allocation8 + $0x174] ss:$8 sps:$4 sm:$0xff]   ;;  %v1801_v8 = vld [vmem:[#allocation8 + $0x170] ss:$8 sps:$4 sm:$0xff]   ;;  %v1809_v11 = vld [vmem:[#allocation8 + $0x164] ss:$8 sps:$4 sm:$0xff]  }
  0x7d   : > { %v1804_v12 = vld [vmem:[#allocation8 + $0x60] ss:$8 sps:$4 sm:$0xff]   ;;  %v1812_v14 = vld [vmem:[#allocation8 + $0x54] ss:$8 sps:$4 sm:$0xff]   ;;  %v1810_v16 = vld [vmem:[#allocation8 + $0x50] ss:$8 sps:$4 sm:$0xff]  }
  0x7e   : > { %713 = vmatpush1.bf16.msra.mxu0 %v1742_v26  ;;  %756 = vmatpush1.bf16.msra.mxu1 %v1743_v27  ;;  %v1807_v13 = vld [vmem:[#allocation8 + $0x160] ss:$8 sps:$4 sm:$0xff]   ;;  %v1815_v15 = vld [vmem:[#allocation8 + $0x154] ss:$8 sps:$4 sm:$0xff]   ;;  %v1813_v17 = vld [vmem:[#allocation8 + $0x150] ss:$8 sps:$4 sm:$0xff]  }
  0x7f   : > { %714 = vmatprep.subr.bf16.mxu0 %v1744_v28  ;;  %757 = vmatprep.subr.bf16.mxu1 %v1746_v29  ;;  %v1818_v18 = vld [vmem:[#allocation8 + $0x44] ss:$8 sps:$4 sm:$0xff]   ;;  %v1816_v20 = vld [vmem:[#allocation8 + $0x40] ss:$8 sps:$4 sm:$0xff]   ;;  %v1824_v22 = vld [vmem:[#allocation8 + $0x34] ss:$8 sps:$4 sm:$0xff]  }
  0x80   : > { %v1821_v19 = vld [vmem:[#allocation8 + $0x144] ss:$8 sps:$4 sm:$0xff]   ;;  %v1819_v21 = vld [vmem:[#allocation8 + $0x140] ss:$8 sps:$4 sm:$0xff]   ;;  %v1827_v23 = vld [vmem:[#allocation8 + $0x134] ss:$8 sps:$4 sm:$0xff]  }
  0x81   : > { %v1822_v24 = vld [vmem:[#allocation8 + $0x30] ss:$8 sps:$4 sm:$0xff]   ;;  %v1830_v26 = vld [vmem:[#allocation8 + $0x24] ss:$8 sps:$4 sm:$0xff]   ;;  %v1828_v28 = vld [vmem:[#allocation8 + $0x20] ss:$8 sps:$4 sm:$0xff]  }
  0x82   : > { %715 = vmatpush1.bf16.msra.mxu0 %v1748_v30  ;;  %758 = vmatpush1.bf16.msra.mxu1 %v1749_v31  ;;  %v1825_v25 = vld [vmem:[#allocation8 + $0x130] ss:$8 sps:$4 sm:$0xff]   ;;  %v1833_v27 = vld [vmem:[#allocation8 + $0x124] ss:$8 sps:$4 sm:$0xff]   ;;  %v1831_v29 = vld [vmem:[#allocation8 + $0x120] ss:$8 sps:$4 sm:$0xff]  }
  0x83   : > { %716 = vmatprep.subr.bf16.mxu0 %v1750_v32  ;;  %759 = vmatprep.subr.bf16.mxu1 %v1752_v33  ;;  %v1836_v30 = vld [vmem:[#allocation8 + $0x14] ss:$8 sps:$4 sm:$0xff]   ;;  %v1834_v32 = vld [vmem:[#allocation8 + $0x10] ss:$8 sps:$4 sm:$0xff]   ;;  %v1866_v51 = vld [vmem:[#allocation8 + $0xc4] ss:$8 sps:$4 sm:$0xff]  }
  0x84   : > { %v1839_v31 = vld [vmem:[#allocation8 + $0x114] ss:$8 sps:$4 sm:$0xff]   ;;  %v1837_v33 = vld [vmem:[#allocation8 + $0x110] ss:$8 sps:$4 sm:$0xff]   ;;  %v1893_v3 = vld [vmem:[#allocation8 + $0x184] ss:$8 sps:$4 sm:$0xff]  }
  0x85   : > { %v1860_v46 = vld [vmem:[#allocation8 + $0xd4] ss:$8 sps:$4 sm:$0xff]   ;;  %v1861_v49 = vld [vmem:[#allocation8 + $0x1d0] ss:$8 sps:$4 sm:$0xff]   ;;  %v1888_v4 = vld [vmem:[#allocation8 + $0x80] ss:$8 sps:$4 sm:$0xff]  }
  0x86   : > { %717 = vmatpush2.bf16.msra.mxu0 %v1754_v34  ;;  %760 = vmatpush2.bf16.msra.mxu1 %v1755_v35  ;;  %v1842_v34 = vld [vmem:[#allocation8 + $0x4] ss:$8 sps:$4 sm:$0xff]   ;;  %s2016_s22 = scalar_lea.vmem %s2344_s17, 512  ;;  %p2417_p2 = scmp.ne.s32.totalorder %s2408_s13, 0 }
  0x87   : > { %718 = vmatprep.subr.bf16.mxu0 %v1756_v36  ;;  %761 = vmatprep.subr.bf16.mxu1 %v1758_v37  ;;  %v1845_v35 = vld [vmem:[#allocation8 + $0x104] ss:$8 sps:$4 sm:$0xff]   ;;  %v1840_v36 = vld [vmem:[#allocation8] ss:$8 sps:$4 sm:$0xff]   ;;  %p2017_p1 = scmp.ne.s32.totalorder %s2344_s17, %s2016_s22  ;;  %s2098_s23 = smov [#allocation10]  }
  0x88   : > { %v1843_v37 = vld [vmem:[#allocation8 + $0x100] ss:$8 sps:$4 sm:$0xff]   ;;  %s2020_s9 = sshll.u32 %s2098_s23, 4  ;;  %s2021_s9 = int_to_ptr.vmem [resolvable:$false] %s2020_s9 }
  0x89   : > { %p2018_p4 = pnand %p2017_p1, %p2417_p2  ;;  %s2022_s7 = scalar_lea.vmem %s2021_s9, 1024 }
  0x8a   : > { %719 = vmatpush2.bf16.msra.mxu0 %v1760_v38  ;;  %762 = vmatpush2.bf16.msra.mxu1 %v1761_v39  ;;  %v1848_v38 = vld [vmem:[#allocation8 + $0xf4] ss:$8 sps:$4 sm:$0xff]   ;;  %p2023_p12 = scmp.lt.s32.totalorder %s2344_s17, %s2021_s9  ;;  %p2024_p5 = scmp.lt.s32.totalorder %s2022_s7, %s2016_s22 }
  0x8b   : > { %720 = vmatprep.subr.bf16.mxu0 %v1762_v40  ;;  %763 = vmatprep.subr.bf16.mxu1 %v1764_v41  ;;  %v1851_v39 = vld [vmem:[#allocation8 + $0x1f4] ss:$8 sps:$4 sm:$0xff]   ;;  %v1846_v40 = vld [vmem:[#allocation8 + $0xf0] ss:$8 sps:$4 sm:$0xff]   ;;  %p2019_p6 = pneg %p2018_p4 }
  0x8c   : > { %v1849_v41 = vld [vmem:[#allocation8 + $0x1f0] ss:$8 sps:$4 sm:$0xff]   ;;  %p2025_p7 = por %p2024_p5, %p2023_p12 }
  0x8e   : > { %721 = vmatpush2.bf16.msra.mxu0 %v1766_v42  ;;  %764 = vmatpush2.bf16.msra.mxu1 %v1767_v43  ;;  %v1854_v42 = vld [vmem:[#allocation8 + $0xe4] ss:$8 sps:$4 sm:$0xff]   ;;  %p2026_p13 = pnand %p2025_p7, %p2019_p6 }
  0x8f   : > { %722 = vmatprep.subr.bf16.mxu0 %v1768_v44  ;;  %765 = vmatprep.subr.bf16.mxu1 %v1770_v45  ;;  %v1857_v43 = vld [vmem:[#allocation8 + $0x1e4] ss:$8 sps:$4 sm:$0xff]   ;;  %v1852_v44 = vld [vmem:[#allocation8 + $0xe0] ss:$8 sps:$4 sm:$0xff]  }
  0x90   : > { %v1855_v45 = vld [vmem:[#allocation8 + $0x1e0] ss:$8 sps:$4 sm:$0xff]  }
  0x92   : > { %723 = vmatpush2.bf16.msra.mxu0 %v1772_v47  ;;  %766 = vmatpush2.bf16.msra.mxu1 %v1773_v48  ;;  %v1863_v47 = vld [vmem:[#allocation8 + $0x1d4] ss:$8 sps:$4 sm:$0xff]   ;;  %v1858_v48 = vld [vmem:[#allocation8 + $0xd0] ss:$8 sps:$4 sm:$0xff]  }
  0x93   : > { %724 = vmatprep.subr.bf16.mxu0 %v1774_v50  ;;  %767 = vmatprep.subr.bf16.mxu1 %v1776_v52  ;;  %v1864_v50 = vld [vmem:[#allocation8 + $0xc0] ss:$8 sps:$4 sm:$0xff]  }
  0x94   : > { %v1867_v52 = vld [vmem:[#allocation8 + $0x1c0] ss:$8 sps:$4 sm:$0xff]  }
  0x96   : > { %725 = vmatpush2.bf16.msra.mxu0 %v1778_v53  ;;  %768 = vmatpush2.bf16.msra.mxu1 %v1779_v54  ;;  %v1869_v53 = vld [vmem:[#allocation8 + $0x1c4] ss:$8 sps:$4 sm:$0xff]   ;;  %v1872_v54 = vld [vmem:[#allocation8 + $0xb4] ss:$8 sps:$4 sm:$0xff]  }
  0x97   : > { %726 = vmatprep.subr.bf16.mxu0 %v1780_v55  ;;  %769 = vmatprep.subr.bf16.mxu1 %v1782_v56  ;;  %v1875_v55 = vld [vmem:[#allocation8 + $0x1b4] ss:$8 sps:$4 sm:$0xff]   ;;  %v1870_v56 = vld [vmem:[#allocation8 + $0xb0] ss:$8 sps:$4 sm:$0xff]  }
  0x9a   : > { %727 = vmatpush2.bf16.msra.mxu0 %v1784_v57  ;;  %770 = vmatpush2.bf16.msra.mxu1 %v1785_v58  ;;  %v1873_v57 = vld [vmem:[#allocation8 + $0x1b0] ss:$8 sps:$4 sm:$0xff]   ;;  %v1878_v58 = vld [vmem:[#allocation8 + $0xa4] ss:$8 sps:$4 sm:$0xff]  }
  0x9b   : > { %728 = vmatprep.subr.bf16.mxu0 %v1786_v59  ;;  %771 = vmatprep.subr.bf16.mxu1 %v1788_v60  ;;  %v1881_v59 = vld [vmem:[#allocation8 + $0x1a4] ss:$8 sps:$4 sm:$0xff]   ;;  %v1876_v60 = vld [vmem:[#allocation8 + $0xa0] ss:$8 sps:$4 sm:$0xff]  }
  0x9e   : > { %729 = vmatpush2.bf16.msra.mxu0 %v1790_v61  ;;  %772 = vmatpush2.bf16.msra.mxu1 %v1791_v62  ;;  %v1879_v61 = vld [vmem:[#allocation8 + $0x1a0] ss:$8 sps:$4 sm:$0xff]   ;;  %v1884_v62 = vld [vmem:[#allocation8 + $0x94] ss:$8 sps:$4 sm:$0xff]  }
  0x9f   : > { %730 = vmatprep.subr.bf16.mxu0 %v1792_v63  ;;  %773 = vmatprep.subr.bf16.mxu1 %v1794_v0  ;;  %v1887_v63 = vld [vmem:[#allocation8 + $0x194] ss:$8 sps:$4 sm:$0xff]   ;;  %v1882_v0 = vld [vmem:[#allocation8 + $0x90] ss:$8 sps:$4 sm:$0xff]  }
  0xa2   : > { %731 = vmatpush2.bf16.msra.mxu0 %v1796_v1  ;;  %774 = vmatpush2.bf16.msra.mxu1 %v1797_v2  ;;  %v1885_v1 = vld [vmem:[#allocation8 + $0x190] ss:$8 sps:$4 sm:$0xff]   ;;  %v1890_v2 = vld [vmem:[#allocation8 + $0x84] ss:$8 sps:$4 sm:$0xff]  }
  0xa3   : > { %1258 = vmatprep.subr.bf16.mxu0 %v1800_v5  ;;  %1301 = vmatprep.subr.bf16.mxu1 %v1803_v6  ;;  %v1891_v5 = vld [vmem:[#allocation8 + $0x180] ss:$8 sps:$4 sm:$0xff]   ;;  %v360_v6 = vlaneseq }
  0xa5   : > { %733 = vmatmul.mubr.bf16.vlgmr.msra.gmra.mxu0 %v292_v9  ;;  %776 = vmatmul.mubr.bf16.vlgmr.msra.gmra.mxu1 %v292_v9 }
  0xa6   : > { %1259 = vmatpush1.bf16.msra.mxu0 %v1798_v7  ;;  %1302 = vmatpush1.bf16.msra.mxu1 %v1801_v8  ;;  %v2296_v7 = vshrl.u32 %v360_v6, 7 }
  0xa7   : > { %1260 = vmatprep.subr.bf16.mxu0 %v1806_v10  ;;  %1303 = vmatprep.subr.bf16.mxu1 %v1809_v11  ;;  %v358_v10 = vld [vmem:[#allocation7] sm:$0xf] }
  0xa8   : > { %v362_v8 = vsub.s32 0, %v2296_v7  ;;  %v370_v9 = vsub.s32 2, %v2296_v7  ;;  %v366_v11 = vsub.s32 1, %v2296_v7 }
  0xaa   : > { %1261 = vmatpush1.bf16.msra.mxu0 %v1804_v12  ;;  %1304 = vmatpush1.bf16.msra.mxu1 %v1807_v13  ;;  %v374_v12 = vsub.s32 3, %v2296_v7  ;;  %v363_v13 = vrot.slane %v358_v10, %v362_v8 }
  0xab   : > { %1262 = vmatprep.subr.bf16.mxu0 %v1812_v14  ;;  %1305 = vmatprep.subr.bf16.mxu1 %v1815_v15  ;;  %v371_v14 = vrot.slane %v358_v10, %v370_v9  ;;  %v367_v15 = vrot.slane %v358_v10, %v366_v11 }
  0xae   : > { %1263 = vmatpush1.bf16.msra.mxu0 %v1810_v16  ;;  %1306 = vmatpush1.bf16.msra.mxu1 %v1813_v17  ;;  %v375_v16 = vrot.slane %v358_v10, %v374_v12 }
  0xaf   : > { %1264 = vmatprep.subr.bf16.mxu0 %v1818_v18  ;;  %1307 = vmatprep.subr.bf16.mxu1 %v1821_v19 }
  0xb2   : > { %1265 = vmatpush1.bf16.msra.mxu0 %v1816_v20  ;;  %1308 = vmatpush1.bf16.msra.mxu1 %v1819_v21 }
  0xb3   : > { %1266 = vmatprep.subr.bf16.mxu0 %v1824_v22  ;;  %1309 = vmatprep.subr.bf16.mxu1 %v1827_v23 }
  0xb6   : > { %1267 = vmatpush1.bf16.msra.mxu0 %v1822_v24  ;;  %1310 = vmatpush1.bf16.msra.mxu1 %v1825_v25 }
  0xb7   : > { %1268 = vmatprep.subr.bf16.mxu0 %v1830_v26  ;;  %1311 = vmatprep.subr.bf16.mxu1 %v1833_v27 }
  0xba   : > { %1269 = vmatpush1.bf16.msra.mxu0 %v1828_v28  ;;  %1312 = vmatpush1.bf16.msra.mxu1 %v1831_v29 }
  0xbb   : > { %1270 = vmatprep.subr.bf16.mxu0 %v1836_v30  ;;  %1313 = vmatprep.subr.bf16.mxu1 %v1839_v31 }
  0xbe   : > { %1271 = vmatpush1.bf16.msra.mxu0 %v1834_v32  ;;  %1314 = vmatpush1.bf16.msra.mxu1 %v1837_v33 }
  0xbf   : > { %1272 = vmatprep.subr.bf16.mxu0 %v1842_v34  ;;  %1315 = vmatprep.subr.bf16.mxu1 %v1845_v35 }
  0xc2   : > { %1273 = vmatpush1.bf16.msra.mxu0 %v1840_v36  ;;  %1316 = vmatpush1.bf16.msra.mxu1 %v1843_v37 }
  0xc3   : > { %1274 = vmatprep.subr.bf16.mxu0 %v1848_v38  ;;  %1317 = vmatprep.subr.bf16.mxu1 %v1851_v39 }
  0xc6   : > { %1275 = vmatpush2.bf16.msra.mxu0 %v1846_v40  ;;  %1318 = vmatpush2.bf16.msra.mxu1 %v1849_v41 }
  0xc7   : > { %1276 = vmatprep.subr.bf16.mxu0 %v1854_v42  ;;  %1319 = vmatprep.subr.bf16.mxu1 %v1857_v43 }
  0xca   : > { %1277 = vmatpush2.bf16.msra.mxu0 %v1852_v44  ;;  %1320 = vmatpush2.bf16.msra.mxu1 %v1855_v45 }
  0xcb   : > { %1278 = vmatprep.subr.bf16.mxu0 %v1860_v46  ;;  %1321 = vmatprep.subr.bf16.mxu1 %v1863_v47 }
  0xce   : > { %1279 = vmatpush2.bf16.msra.mxu0 %v1858_v48  ;;  %1322 = vmatpush2.bf16.msra.mxu1 %v1861_v49 }
  0xcf   : > { %1280 = vmatprep.subr.bf16.mxu0 %v1866_v51  ;;  %1323 = vmatprep.subr.bf16.mxu1 %v1869_v53 }
  0xd2   : > { %1281 = vmatpush2.bf16.msra.mxu0 %v1864_v50  ;;  %1324 = vmatpush2.bf16.msra.mxu1 %v1867_v52 }
  0xd3   : > { %1282 = vmatprep.subr.bf16.mxu0 %v1872_v54  ;;  %1325 = vmatprep.subr.bf16.mxu1 %v1875_v55 }
  0xd6   : > { %1283 = vmatpush2.bf16.msra.mxu0 %v1870_v56  ;;  %1326 = vmatpush2.bf16.msra.mxu1 %v1873_v57 }
  0xd7   : > { %1284 = vmatprep.subr.bf16.mxu0 %v1878_v58  ;;  %1327 = vmatprep.subr.bf16.mxu1 %v1881_v59 }
  0xda   : > { %1285 = vmatpush2.bf16.msra.mxu0 %v1876_v60  ;;  %1328 = vmatpush2.bf16.msra.mxu1 %v1879_v61 }
  0xdb   : > { %1286 = vmatprep.subr.bf16.mxu0 %v1884_v62  ;;  %1329 = vmatprep.subr.bf16.mxu1 %v1887_v63 }
  0xde   : > { %1287 = vmatpush2.bf16.msra.mxu0 %v1882_v0  ;;  %1330 = vmatpush2.bf16.msra.mxu1 %v1885_v1 }
  0xdf   : > { %1288 = vmatprep.subr.bf16.mxu0 %v1890_v2  ;;  %1331 = vmatprep.subr.bf16.mxu1 %v1893_v3 }
  0xe2   : > { %1289 = vmatpush2.bf16.msra.mxu0 %v1888_v4  ;;  %1332 = vmatpush2.bf16.msra.mxu1 %v1891_v5 }
 0x165   : > { %v734_v17 = vpop.f32.mrf.mxu0  ;;  %v777_v18 = vpop.f32.mrf.mxu1 }
 0x166   : > { %v2306_v19 = vadd.f32 %v734_v17, %v363_v13  ;;  %v2308_v20 = vadd.f32 %v777_v18, %v371_v14 }
 0x167   : > { %v736_v21 = vpop.f32.mrf.mxu0  ;;  %v779_v22 = vpop.f32.mrf.mxu1 }
 0x168   : > { %v794_v23 = vmul.f32 0.044715, %v2306_v19  ;;  %v796_v24 = vmul.f32 0.044715, %v2308_v20  ;;  %v737_v25 = vadd.f32 %v736_v21, %v367_v15  ;;  %v2312_v26 = vadd.f32 %v779_v22, %v375_v16 }
 0x169   : > { %v738_v27 = vpop.f32.mrf.mxu0  ;;  %v781_v28 = vpop.f32.mrf.mxu1  ;;  %v786_v22 = vmul.f32 0.5, %v2306_v19 }
 0x16a   : > { %v802_v29 = vmul.f32 %v794_v23, %v2306_v19  ;;  %v804_v30 = vmul.f32 %v796_v24, %v2308_v20  ;;  %v795_v31 = vmul.f32 0.044715, %v737_v25  ;;  %v797_v32 = vmul.f32 0.044715, %v2312_v26 }
 0x16b   : > { %v739_v33 = vadd.f32 %v738_v27, %v363_v13  ;;  %v2317_v34 = vadd.f32 %v781_v28, %v371_v14  ;;  %v740_v35 = vpop.f32.mrf.mxu0  ;;  %v783_v36 = vpop.f32.mrf.mxu1  ;;  %v787_v18 = vmul.f32 0.5, %v737_v25 }
 0x16c   : > { %v810_v37 = vmul.f32 %v802_v29, %v2306_v19  ;;  %v812_v38 = vmul.f32 %v804_v30, %v2308_v20  ;;  %v803_v39 = vmul.f32 %v795_v31, %v737_v25  ;;  %v805_v40 = vmul.f32 %v797_v32, %v2312_v26 }
 0x16d   : > { %v798_v41 = vmul.f32 0.044715, %v739_v33  ;;  %v800_v42 = vmul.f32 0.044715, %v2317_v34  ;;  %v741_v43 = vadd.f32 %v740_v35, %v367_v15  ;;  %v784_v44 = vadd.f32 %v783_v36, %v375_v16 }
 0x16e   : > { %v818_v45 = vadd.f32 %v810_v37, %v2306_v19  ;;  %v820_v46 = vadd.f32 %v812_v38, %v2308_v20  ;;  %v811_v47 = vmul.f32 %v803_v39, %v737_v25  ;;  %v813_v48 = vmul.f32 %v805_v40, %v2312_v26 }
 0x16f   : > { %v806_v49 = vmul.f32 %v798_v41, %v739_v33  ;;  %v808_v50 = vmul.f32 %v800_v42, %v2317_v34  ;;  %v799_v51 = vmul.f32 0.044715, %v741_v43  ;;  %v801_v52 = vmul.f32 0.044715, %v784_v44 }
 0x170   : > { %v826_v53 = vmul.f32 0.7978846, %v818_v45  ;;  %v828_v54 = vmul.f32 0.7978846, %v820_v46  ;;  %v819_v55 = vadd.f32 %v811_v47, %v737_v25  ;;  %v821_v61 = vadd.f32 %v813_v48, %v2312_v26 }
 0x171   : > { %v814_v56 = vmul.f32 %v806_v49, %v739_v33  ;;  %v816_v57 = vmul.f32 %v808_v50, %v2317_v34  ;;  %v807_v58 = vmul.f32 %v799_v51, %v741_v43  ;;  %v809_v59 = vmul.f32 %v801_v52, %v784_v44 }
 0x172   : > { %v827_v60 = vmul.f32 0.7978846, %v819_v55  ;;  %1894 = vtanh.f32 %v826_v53  ;;  %v829_v2 = vmul.f32 0.7978846, %v821_v61  ;;  %v790_v28 = vmul.f32 0.5, %v739_v33 }
 0x173   : > { %v822_v62 = vadd.f32 %v814_v56, %v739_v33  ;;  %v824_v63 = vadd.f32 %v816_v57, %v2317_v34  ;;  %v815_v0 = vmul.f32 %v807_v58, %v741_v43  ;;  %1896 = vtanh.f32 %v828_v54 }
 0x174   : > { %v817_v1 = vmul.f32 %v809_v59, %v784_v44  ;;  %1898 = vtanh.f32 %v827_v60  ;;  %v791_v32 = vmul.f32 0.5, %v741_v43  ;;  %v792_v36 = vmul.f32 0.5, %v2317_v34 }
 0x175   : > { %v830_v3 = vmul.f32 0.7978846, %v822_v62  ;;  %v832_v4 = vmul.f32 0.7978846, %v824_v63  ;;  %v823_v5 = vadd.f32 %v815_v0, %v741_v43  ;;  %1900 = vtanh.f32 %v829_v2 }
 0x176   : > { %v825_v6 = vadd.f32 %v817_v1, %v784_v44  ;;  %v789_v38 = vmul.f32 0.5, %v2312_v26  ;;  %v793_v39 = vmul.f32 0.5, %v784_v44  ;;  %v788_v19 = vmul.f32 0.5, %v2308_v20  ;;  %v926_v26 = vld [vmem:[%s2396_s4] sm:$0x3] }
 0x177   : > { %1902 = vtanh.f32 %v830_v3  ;;  %v831_v9 = vmul.f32 0.7978846, %v823_v5  ;;  %v931_v20 = vrot.slane %v926_v26, %v362_v8  ;;  %v935_v44 = vrot.slane %v926_v26, %v366_v11 }
 0x178   : > { %1904 = vtanh.f32 %v832_v4  ;;  %v833_v10 = vmul.f32 0.7978846, %v825_v6 }
 0x179   : > { %1906 = vtanh.f32 %v831_v9 }
 0x17a   : > { %1908 = vtanh.f32 %v833_v10 }
 0x17f   : > { %v1895_v12 = vpop.eup %1894 }
 0x180   : > { %v1897_v13 = vpop.eup %1896  ;;  %v842_v29 = vadd.f32 1.0, %v1895_v12 }
 0x181   : > { %v1899_v14 = vpop.eup %1898  ;;  %v844_v37 = vadd.f32 1.0, %v1897_v13 }
 0x182   : > { %v1901_v15 = vpop.eup %1900  ;;  %v843_v21 = vadd.f32 1.0, %v1899_v14  ;;  %v850_v47 = vmul.f32 %v842_v29, %v786_v22 }
 0x183   : > { %v845_v27 = vadd.f32 1.0, %v1901_v15  ;;  %v852_v49 = vmul.f32 %v844_v37, %v788_v19 }
 0x184   : > { %v1903_v16 = vpop.eup %1902  ;;  %v851_v41 = vmul.f32 %v843_v21, %v787_v18 }
 0x185   : > { %v1905_v17 = vpop.eup %1904  ;;  %v846_v23 = vadd.f32 1.0, %v1903_v16  ;;  %v853_v46 = vmul.f32 %v845_v27, %v789_v38 }
 0x186   : > { %v1907_v24 = vpop.eup %1906  ;;  %v848_v30 = vadd.f32 1.0, %v1905_v17 }
 0x187   : > { %v1909_v31 = vpop.eup %1908  ;;  %v847_v35 = vadd.f32 1.0, %v1907_v24  ;;  %v854_v25 = vmul.f32 %v846_v23, %v790_v28 }
 0x188   : > { %v849_v40 = vadd.f32 1.0, %v1909_v31  ;;  %v856_v45 = vmul.f32 %v848_v30, %v792_v36 }
 0x189   : > { %v855_v42 = vmul.f32 %v847_v35, %v791_v32  ;;  %v858_v50 = vpack.c.bf16 %v854_v25, %v850_v47 }
 0x18a   : > { %v857_v33 = vmul.f32 %v849_v40, %v793_v39  ;;  %v860_v34 = vpack.c.bf16 %v856_v45, %v852_v49 }
 0x18b   : > { %v859_v48 = vpack.c.bf16 %v855_v42, %v851_v41 }
 0x18c   : > { %v861_v43 = vpack.c.bf16 %v857_v33, %v853_v46 }
 0x18d   : > { %1290 = vmatprep.mubr.bf16.mxu0 %v859_v48 }
 0x18e   : > { %1333 = vmatprep.mubr.bf16.mxu1 %v861_v43  ;;  %1291 = vmatmul.mubr.bf16.vlgmr.msra.gmra.mxu0 %v858_v50 }
 0x18f   : > { %1334 = vmatmul.mubr.bf16.vlgmr.msra.gmra.mxu1 %v860_v34 }
 0x24e   : > { %v1292_v51 = vpop.f32.mrf.mxu0 }
 0x24f   : > { %v1293_v52 = vadd.f32 %v1292_v51, %v931_v20  ;;  %v1335_v53 = vpop.f32.mrf.mxu1 }
 0x250   : > { %v1294_v54 = vpop.f32.mrf.mxu0 }
 0x251   : > { %v1336_v55 = vadd.f32 %v1335_v53, %v1293_v52  ;;  %v1295_v56 = vadd.f32 %v1294_v54, %v935_v44  ;;  %v1337_v57 = vpop.f32.mrf.mxu1 }
 0x252   : > { %v1296_v58 = vpop.f32.mrf.mxu0 }
 0x253   : > { %1344 = vst [vmem:[%s285_s11] sm:$0xff] %v1336_v55  ;;  %v1338_v59 = vadd.f32 %v1337_v57, %v1295_v56  ;;  %v1297_v60 = vadd.f32 %v1296_v58, %v931_v20  ;;  %v1339_v8 = vpop.f32.mrf.mxu1 }
 0x254   : > { %v1298_v7 = vpop.f32.mrf.mxu0 }
 0x255   : > { %1345 = vst [vmem:[%s285_s11 + $0x8] sm:$0xff] %v1338_v59  ;;  %v1340_v11 = vadd.f32 %v1339_v8, %v1297_v60  ;;  %v1299_v61 = vadd.f32 %v1298_v7, %v935_v44  ;;  %v1341_v62 = vpop.f32.mrf.mxu1 }
 0x257   : > { %1346 = vst [vmem:[%s285_s11 + $0x10] sm:$0xff] %v1340_v11  ;;  %v1342_v63 = vadd.f32 %v1341_v62, %v1299_v61 }
 0x259   : > { %1347 = vst [vmem:[%s285_s11 + $0x18] sm:$0xff] %v1342_v63 }
 0x25a   : > { %2029 = shalt.err (!%p2026_p13)
}
 0x25b   : > { %s2030_s10 = scalar_lea.hbm %s2349_s16, 512  ;;  %s2034_s24 = scalar_lea.hbm %s2397_s5, 1024 }
 0x25c   : > { %p2031_p9 = scmp.ne.s32.totalorder %s2349_s16, %s2030_s10  ;;  %p2035_p11 = scmp.lt.s32.totalorder %s2349_s16, %s2397_s5 }
 0x25d   : > { %p2036_p0 = scmp.lt.s32.totalorder %s2034_s24, %s2030_s10 }
 0x25e   : > { %p2032_p8 = pnand %p2031_p9, %p2417_p2 }
 0x25f   : > { %p2037_p3 = por %p2036_p0, %p2035_p11 }
 0x260   : > { %p2033_p10 = pneg %p2032_p8 }
 0x262   : > { %p2038_p1 = pnand %p2037_p3, %p2033_p10 }
 0x264   : > { %2041 = shalt.err (!%p2038_p1)
}
 0x265   : > { %s2099_s27 = smov 256   ;;  %s2100_s30 = smov 16  }
 0x266   : > { %1633 = dma.vmem_to_hbm [thread:$0]  (%p2417_p2), %s2344_s17, 512, %s2349_s16, %s1349_s29, %s2099_s27, %s2099_s27, %s2100_s30  }
 0x267 PF: > { %s1378_s15 = sand.u32 1, %s2076_s18   ;;  %p2418_p4 = scmp.ne.s32.totalorder %s2404_s25, 0 }
 0x268   : > { %p2419_p6 = scmp.ge.s32.totalorder %s2088_s21, 2  ;;  %s1379_s22 = scalar_lea.sflag [#allocation4], %s1378_s15 }
 0x26a   : > { %p1650_p12 = pnand %p2419_p6, %p2418_p4 }
 0x26c   : > { %p1651_p5 = pneg %p1650_p12 }
 0x26e   : > { %2071 = dma.done.wait (%p1651_p5), %s1379_s22, 512  }
 0x26f   : > { %2073 = vsyncadd (%p1651_p5), %s1379_s22, 4294966784  ;;  %p20_p7 = scmp.ge.s32.totalorder %s2214_s6, 4   ;;  %s2420_s18 = smov %s2080_s19 }
 0x270   : > { %s2421_s19 = smov %s2084_s20  ;;  %s2422_s20 = smov %s2224_s12 }
 0x271   : > { %s2423_s21 = smov %s2214_s6  ;;  %22 = sbr.rel (!%p20_p7) target bundleno = 7 (0x7), region = 97 }
 0x276   :  { %1384 = vsyncpa [#allocation3], 1 }
 0x277   :  { %1386 = vsyncpa [#allocation3 + $0x1], 1 }
 0x278   :  { %1387 = vsyncpa [#allocation6], 1 }
 0x279   :  { %1388 = vsyncpa [#allocation9], 1 }
 0x27a   :  { %1389 = vsyncpa [#allocation4], 1 }
 0x27b   :  { %1391 = vsyncpa [#allocation4 + $0x1], 1 }

</bundles_post_ra>
